<compile_context>
chip_gen: v5e
topology: v5e:2x2
jax: 0.10.0
libtpu: 0.0.40
codegen_flags: <defaults>
</compile_context>

<pallas_src>
import functools

import jax
import jax.numpy as jnp
from jax.experimental import pallas as pl
from jax.experimental.pallas import tpu as pltpu


def _round_up(x, m):
    return ((x + m - 1) // m) * m


def _simpleconv_kernel(adj_ref, feat_ref, w_ref, out_ref, acc_ref, *,
                       rem_k, ragged_k):
    """Grid = (row_tiles, source_tiles).  acc accumulates (adj @ feat) per row tile."""
    k = pl.program_id(1)
    k_last = pl.num_programs(1) - 1

    @pl.when(k == 0)
    def _init():
        acc_ref[...] = jnp.zeros_like(acc_ref)

    def accumulate(adj_blk, feat_blk):
        acc_ref[...] += jnp.dot(adj_blk, feat_blk,
                                preferred_element_type=jnp.float32)

    if ragged_k:
        # Static raggedness: last source tile only covers rem_k valid nodes.
        @pl.when(k != k_last)
        def _full():
            accumulate(adj_ref[...], feat_ref[...])

        @pl.when(k == k_last)
        def _masked():
            adj_blk = adj_ref[...]
            col = jax.lax.broadcasted_iota(jnp.int32, adj_blk.shape, 1)
            adj_blk = jnp.where(col < rem_k, adj_blk, jnp.zeros_like(adj_blk))
            feat_blk = feat_ref[...]
            row = jax.lax.broadcasted_iota(jnp.int32, feat_blk.shape, 0)
            feat_blk = jnp.where(row < rem_k, feat_blk, jnp.zeros_like(feat_blk))
            accumulate(adj_blk, feat_blk)
    else:
        accumulate(adj_ref[...], feat_ref[...])

    @pl.when(k == k_last)
    def _epilogue():
        # Cheap per-row-tile epilogue: (tm, in_feats) @ (in_feats, out_pad) + ReLU.
        h = jnp.dot(acc_ref[...], w_ref[...].astype(jnp.float32),
                    preferred_element_type=jnp.float32)
        out_ref[...] = jnp.maximum(h, 0.0).astype(out_ref.dtype)


def simple_conv(adj, feat, W, *, compute_dtype=jnp.float32,
                tm_target=512, tk_target=2048):
    """relu(adj @ feat @ W) via a tiled, pipelined Pallas kernel.

    adj : (N, N)  with adj[dst, src] = edge weight (0 where no edge)
    feat: (N, in_feats)
    W   : (in_feats, out_feats)
    """
    n, in_feats = feat.shape
    out_feats = W.shape[1]
    assert adj.shape == (n, n)

    # Sublane alignment for the row tile (16 for 2-byte dtypes, 8 for f32).
    sub = 8 if jnp.dtype(compute_dtype).itemsize == 4 else 16

    # Row tile: aim for >=2 row tiles so "parallel" can shard across
    # v7x's two TensorCores whenever the graph is big enough.
    if n >= 2 * tm_target:
        tm = tm_target
    elif n >= 2 * sub:
        tm = _round_up(pl.cdiv(n, 2), sub)
    else:
        tm = _round_up(max(n, 1), sub)
    m_tiles = pl.cdiv(n, tm)

    # Source-node (reduction) tile, lane-aligned.  Ragged last tile handled
    # in-kernel — no padded copy of the N^2 adjacency is ever materialized.
    tk = min(tk_target, _round_up(n, 128))
    k_tiles = pl.cdiv(n, tk)
    rem_k = n - (k_tiles - 1) * tk
    ragged_k = rem_k != tk

    out_pad = _round_up(out_feats, 128)   # lane-dense output -> unmasked stores

    adj_c = adj.astype(compute_dtype)     # no-op when dtypes already match
    feat_c = feat.astype(compute_dtype)
    if out_pad != out_feats:
        w_c = jnp.zeros((in_feats, out_pad), compute_dtype).at[:, :out_feats].set(
            W.astype(compute_dtype))
    else:
        w_c = W.astype(compute_dtype)

    kernel = functools.partial(_simpleconv_kernel, rem_k=rem_k, ragged_k=ragged_k)

    out_p = pl.pallas_call(
        kernel,
        out_shape=jax.ShapeDtypeStruct((n, out_pad), jnp.float32),
        grid_spec=pltpu.PrefetchScalarGridSpec(
            num_scalar_prefetch=0,
            grid=(m_tiles, k_tiles),
            in_specs=[
                pl.BlockSpec((tm, tk), lambda i, k: (i, k)),          # adj tile
                pl.BlockSpec((tk, in_feats), lambda i, k: (k, 0)),    # feat tile (narrow)
                pl.BlockSpec((in_feats, out_pad), lambda i, k: (0, 0)),  # W (constant idx)
            ],
            out_specs=pl.BlockSpec((tm, out_pad), lambda i, k: (i, 0)),
            scratch_shapes=[pltpu.VMEM((tm, in_feats), jnp.float32)],
        ),
        compiler_params=pltpu.CompilerParams(
            dimension_semantics=("parallel", "arbitrary"),
            vmem_limit_bytes=32 * 1024 * 1024,
        ),
    )(adj_c, feat_c, w_c)

    if out_pad != out_feats:
        return out_p[:, :out_feats]
    return out_p


def reference(adj, feat, W):
    return jnp.maximum(adj @ (feat @ W), 0.0)


if __name__ == "__main__":
    IN_FEATS, OUT_FEATS = 8, 32
    key = jax.random.PRNGKey(0)

    def make_graph(k, n):
        k_feat, k_w, k_adj, k_mask = jax.random.split(k, 4)
        feat = jax.random.normal(k_feat, (n, IN_FEATS), dtype=jnp.float32)
        W = jax.random.normal(k_w, (IN_FEATS, OUT_FEATS), dtype=jnp.float32)
        edge_w = jax.random.uniform(k_adj, (n, n), dtype=jnp.float32)
        edge_mask = (jax.random.uniform(k_mask, (n, n)) < 0.3).astype(jnp.float32)
        return edge_w * edge_mask, feat, W

    k1, k2 = jax.random.split(key)

    # Aligned graph: N divides cleanly into tiles -> no masking, no adj padding.
    adj, feat, W = make_graph(k1, 256)
    ref = reference(adj, feat, W)
    out = simple_conv(adj, feat, W)
    jax.block_until_ready(out)
    assert out.shape == (256, OUT_FEATS)
    assert jnp.allclose(out, ref, atol=1e-3, rtol=1e-3)

    # Ragged graph: exercises the in-kernel broadcasted_iota mask on the last
    # source tile and a ragged row tile, still with zero adj padding in HBM.
    adj, feat, W = make_graph(k2, 200)
    ref = reference(adj, feat, W)
    out = simple_conv(adj, feat, W)
    jax.block_until_ready(out)
    assert out.shape == (200, OUT_FEATS)
    assert jnp.allclose(out, ref, atol=1e-3, rtol=1e-3)

    # bf16-input path (f32 MXU accumulation): halves adj HBM bytes for
    # production-scale graphs; looser tolerance from input rounding.
    out_bf16 = simple_conv(adj, feat, W, compute_dtype=jnp.bfloat16)
    jax.block_until_ready(out_bf16)
    assert out_bf16.shape == (200, OUT_FEATS)
    assert jnp.allclose(out_bf16, ref, atol=5e-1, rtol=5e-2)

    print("KERNEL_OK")
</pallas_src>

<mosaic_0001>
module attributes {stable_mosaic.version = 11 : i64} {
  func.func @_simpleconv_kernel(%arg0: i32, %arg1: i32, %arg2: memref<128x256xf32, #tpu.memory_space<vmem>>, %arg3: memref<256x8xf32, #tpu.memory_space<vmem>>, %arg4: memref<8x128xf32, #tpu.memory_space<vmem>>, %arg5: memref<128x128xf32, #tpu.memory_space<vmem>>, %arg6: memref<128x8xf32, #tpu.memory_space<vmem>>) attributes {dimension_semantics = [#tpu.dimension_semantics<parallel>, #tpu.dimension_semantics<arbitrary>], iteration_bounds = array<i64: 2, 1>, scalar_prefetch = 0 : i64, scratch_operands = 1 : i64, tpu.core_type = #tpu.core_type<tc>, window_params = [{transform_indices = @transform_0, window_bounds = array<i64: 128, 256>}, {transform_indices = @transform_1, window_bounds = array<i64: 256, 8>}, {pipeline_mode = #tpu.pipeline_mode<synchronous>, transform_indices = @transform_2, window_bounds = array<i64: 8, 128>}, {transform_indices = @transform_3, window_bounds = array<i64: 128, 128>}]} {
    %c0_i32 = arith.constant 0 : i32
    %0 = arith.cmpi eq, %arg1, %c0_i32 : i32
    %1 = arith.extui %0 : i1 to i32
    %c0_i32_0 = arith.constant 0 : i32
    %2 = arith.cmpi ne, %1, %c0_i32_0 : i32
    scf.if %2 {
      %cst_10 = arith.constant 0.000000e+00 : f32
      %12 = vector.broadcast %cst_10 : f32 to vector<128x8xf32>
      %c0_11 = arith.constant 0 : index
      %c0_12 = arith.constant 0 : index
      %13 = vector.load %arg6[%c0_11, %c0_12] : memref<128x8xf32, #tpu.memory_space<vmem>>, vector<128x8xf32>
      tpu.vector_store %arg6[%c0_11, %c0_12], %12 {strides = array<i32>} : memref<128x8xf32, #tpu.memory_space<vmem>>, vector<128x8xf32>,
    } else {
    }
    %c0 = arith.constant 0 : index
    %c0_1 = arith.constant 0 : index
    %3 = vector.load %arg2[%c0, %c0_1] : memref<128x256xf32, #tpu.memory_space<vmem>>, vector<128x256xf32>
    %c0_2 = arith.constant 0 : index
    %c0_3 = arith.constant 0 : index
    %4 = vector.load %arg3[%c0_2, %c0_3] : memref<256x8xf32, #tpu.memory_space<vmem>>, vector<256x8xf32>
    %c0_4 = arith.constant 0 : index
    %c0_5 = arith.constant 0 : index
    %5 = vector.load %arg6[%c0_4, %c0_5] : memref<128x8xf32, #tpu.memory_space<vmem>>, vector<128x8xf32>
    %cst = arith.constant dense<0.000000e+00> : vector<128x8xf32>
    %6 = tpu.matmul %3, %4, %cst {dimension_numbers = #tpu.dot_dimension_numbers<[1], [0], [0], [1], [0, 0, 1, 1], [], []>} : vector<128x256xf32>, vector<256x8xf32>, vector<128x8xf32> -> vector<128x8xf32>
    %7 = arith.addf %5, %6 : vector<128x8xf32>
    %c0_6 = arith.constant 0 : index
    %c0_7 = arith.constant 0 : index
    %8 = vector.load %arg6[%c0_6, %c0_7] : memref<128x8xf32, #tpu.memory_space<vmem>>, vector<128x8xf32>
    tpu.vector_store %arg6[%c0_6, %c0_7], %7 {strides = array<i32>} : memref<128x8xf32, #tpu.memory_space<vmem>>, vector<128x8xf32>,
    %c0_i32_8 = arith.constant 0 : i32
    %9 = arith.cmpi eq, %arg1, %c0_i32_8 : i32
    %10 = arith.extui %9 : i1 to i32
    %c0_i32_9 = arith.constant 0 : i32
    %11 = arith.cmpi ne, %10, %c0_i32_9 : i32
    scf.if %11 {
      %c0_10 = arith.constant 0 : index
      %c0_11 = arith.constant 0 : index
      %12 = vector.load %arg6[%c0_10, %c0_11] : memref<128x8xf32, #tpu.memory_space<vmem>>, vector<128x8xf32>
      %c0_12 = arith.constant 0 : index
      %c0_13 = arith.constant 0 : index
      %13 = vector.load %arg4[%c0_12, %c0_13] : memref<8x128xf32, #tpu.memory_space<vmem>>, vector<8x128xf32>
      %cst_14 = arith.constant dense<0.000000e+00> : vector<128x128xf32>
      %14 = tpu.matmul %12, %13, %cst_14 {dimension_numbers = #tpu.dot_dimension_numbers<[1], [0], [0], [1], [0, 0, 1, 1], [], []>} : vector<128x8xf32>, vector<8x128xf32>, vector<128x128xf32> -> vector<128x128xf32>
      %cst_15 = arith.constant 0.000000e+00 : f32
      %15 = vector.broadcast %cst_15 : f32 to vector<128x128xf32>
      %16 = arith.maximumf %14, %15 : vector<128x128xf32>
      %c0_16 = arith.constant 0 : index
      %c0_17 = arith.constant 0 : index
      %17 = vector.load %arg5[%c0_16, %c0_17] : memref<128x128xf32, #tpu.memory_space<vmem>>, vector<128x128xf32>
      tpu.vector_store %arg5[%c0_16, %c0_17], %16 {strides = array<i32>} : memref<128x128xf32, #tpu.memory_space<vmem>>, vector<128x128xf32>,
    } else {
    }
    return
  }
  func.func @transform_0(%arg0: i32, %arg1: i32) -> (i32, i32) {
    %c0_i32 = arith.constant 0 : i32
    return %arg0, %arg1 : i32, i32
  }
  func.func @transform_1(%arg0: i32, %arg1: i32) -> (i32, i32) {
    %c0_i32 = arith.constant 0 : i32
    %c0_i32_0 = arith.constant 0 : i32
    return %arg1, %c0_i32 : i32, i32
  }
  func.func @transform_2(%arg0: i32, %arg1: i32) -> (i32, i32) {
    %c0_i32 = arith.constant 0 : i32
    %c0_i32_0 = arith.constant 0 : i32
    %c0_i32_1 = arith.constant 0 : i32
    return %c0_i32, %c0_i32_0 : i32, i32
  }
  func.func @transform_3(%arg0: i32, %arg1: i32) -> (i32, i32) {
    %c0_i32 = arith.constant 0 : i32
    %c0_i32_0 = arith.constant 0 : i32
    return %arg0, %c0_i32 : i32, i32
  }
}

</mosaic_0001>

<bundles_post_ra>
// kernel: tpu_custom_call.1
= control target key start
LH: loop header
LB: loop body
LE: loop exit
PB: predicated region body
PF: predicated region fallthrough
CT: control target
= control target key end

     0   :  { %8 = vsyncpa [#allocation4], 0  ;;  %s1412_s0 = inlined_call_operand.hbm [shape: f32[256,256], index: 0, kind: input, shape index: {}]   ;;  %s1413_s1 = inlined_call_operand.vmem [shape: f32[256,8], index: 1, kind: input, shape index: {}]   ;;  %s1414_s2 = inlined_call_operand.vmem [shape: f32[8,128], index: 2, kind: input, shape index: {}]   ;;  %s1415_s3 = inlined_call_operand.hbm [shape: f32[256,128], index: 3, kind: output, shape index: {}]  }
   0x1   :  { %10 = vsyncpa [#allocation4 + $0x1], 0 }
   0x2   :  { %11 = vsyncpa [#allocation5], 0 }
   0x3   :  { %13 = vsyncpa [#allocation5 + $0x1], 0  ;;  %s1052_s12 = smov 0   ;;  %s1054_s13 = smov 0  }
   0x4   :  { %s1056_s14 = smov 0   ;;  %s1058_s15 = smov 0  }
   0x5   :  { %s1060_s16 = smov 0   ;;  %s1062_s17 = smov 0  }
   0x6 LB: > { %s777_s18 = sadd.s32 4294967295, %s1025_s17   ;;  %s778_s19 = sadd.s32 4294967294, %s1025_s17   ;;  %s1025_s17 = sphi %s1062_s17, %s19_s17   ;;  %s1021_s16 = sphi %s1060_s16, %s1424_s16   ;;  %s1017_s15 = sphi %s1058_s15, %s1423_s15   ;;  %s1013_s14 = sphi %s1056_s14, %s1422_s14   ;;  %s1009_s13 = sphi %s1054_s13, %s1421_s13   ;;  %s1005_s12 = sphi %s1052_s12, %s1420_s12  }
   0x7   : > { %s31_s20 = sadd.s32 1, %s1021_s16  ;;  %s40_s21 = sadd.s32 1, %s1013_s14 }
   0x8   : > { %p33_p0 = scmp.ge.s32.totalorder %s31_s20, 2  ;;  %p47_p1 = scmp.ne.s32.totalorder %s1013_s14, %s1009_s13 }
   0x9   : > { %p48_p2 = scmp.eq.s32.totalorder %s1025_s17, 0  ;;  %p53_p3 = scmp.ne.s32.totalorder %s1009_s13, %s1005_s12 }
   0xa   : > { %s1426_s20 = smov (%p33_p0, %s31_s20), 0  ;;  %p54_p5 = scmp.eq.s32.totalorder %s777_s18, 0 }
   0xb   : > { %p1093_p4 = por %p48_p2, %p47_p1  ;;  %s35_s23 = ssub.s32 %s1021_s16, %s1426_s20 }
   0xc   : > { %p124_p6 = scmp.eq.s32.totalorder %s777_s18, 1  ;;  %p38_p7 = scmp.eq.s32.totalorder %s35_s23, 0 }
   0xd   : > { %p1099_p8 = por %p54_p5, %p53_p3  ;;  %p130_p10 = scmp.eq.s32.totalorder %s778_s19, 1 }
   0xe   : > { %p1103_p9 = por %p124_p6, %p47_p1  ;;  %p781_p12 = scmp.ge.s32.totalorder %s1025_s17, 2 }
   0xf   : > { %s1108_s26 = scalar_select %p38_p7, %s1013_s14, %s40_s21  }
  0x10   : > { %p1110_p11 = por %p130_p10, %p53_p3  ;;  %p858_p13 = scmp.lt.s32.totalorder %s1025_s17, 2 }
  0x11   : > { %s162_s28 = sand.u32 1, %s1013_s14   ;;  %s811_s30 = sshll.u32 %s1021_s16, 8 }
  0x12   : > { %s782_s29 = sshll.u32 %s162_s28, 8  ;;  %s174_s6 = scalar_lea.hbm %s1412_s0, %s811_s30 }
  0x13   : > { %s166_s7 = scalar_lea.vmem [#allocation3], %s782_s29  ;;  %s175_s9 = sshll.u32 %s174_s6, 4  ;;  %s176_s9 = int_to_ptr.hbm [resolvable:$true] %s175_s9 }
  0x14   : > { %s177_s8 = sshll.u32 %s166_s7, 4  ;;  %p851_p0 = pnand %p858_p13, %p1093_p4  ;;  %s178_s8 = int_to_ptr.vmem [resolvable:$true] %s177_s8 }
  0x15   : > { %p786_p1 = scmp.ge.s32.totalorder %s1025_s17, 1  ;;  %s163_s10 = scalar_lea.sflag [#allocation4], %s162_s28 }
  0x16   : > { %s1027_s11 = smov 256   ;;  %s1028_s18 = smov 16  }
  0x17   : > { %853 = dma.hbm_to_vmem [thread:$0]  (!%p851_p0), %s176_s9, 4096, %s178_s8, %s163_s10, %s1027_s11, %s1027_s11, %s1028_s18  }
  0x18   : > { %p185_p2 = scmp.lt.s32.totalorder %s1025_s17, 3 }
  0x1a   : > { %p186_p3 = pnand %p786_p1, %p185_p2 }
  0x1b   : > { %s1126_s19 = sand.u32 (!%p186_p3), 1, %s1009_s13  }
  0x1c   : > { %189 = sbr.rel (%p186_p3) target bundleno = 455 (0x1c7), region = 32  ;;  %s787_s21 = sshll.u32 (!%p186_p3), %s1126_s19, 8 }
  0x1d   : > { %s192_s23 = scalar_lea.sflag (!%p186_p3), [#allocation4], %s1126_s19  ;;  %s1130_s29 = scalar_lea.vmem (!%p186_p3), [#allocation3], %s787_s21 }
  0x21   : > { %996 = dma.done.wait (%p1099_p8), %s192_s23, 4096  }
  0x22   : > { %998 = vsyncadd (%p1099_p8), %s192_s23, 4294963200  ;;  %v301_v0 = vld [vmem:[%s1413_s1 + $0x78] sm:$0xff]  ;;  %v300_v2 = vld [vmem:[%s1413_s1 + $0x70] sm:$0xff]  ;;  %vm237_vm0 = vcmask 64512   ;;  %s788_s6 = sshll.u32 %s1126_s19, 7  ;;  %s812_s8 = sshll.u32 %s1017_s15, 7 }
  0x23   : > { %v1142_v1 = vld [vmem:[%s1413_s1 + $0xf8] sm:$0xff]  ;;  %334 = vmatpush.msra.mxu0 %v301_v0  ;;  %813 = vmatpush.msra.mxu3 %v301_v0  ;;  %v1150_v3 = vld [vmem:[%s1413_s1 + $0xf0] sm:$0xff]  ;;  %v299_v4 = vld [vmem:[%s1413_s1 + $0x68] sm:$0xff]  ;;  %v1029_v0 = vmov 0.0   ;;  %s1355_s7 = scalar_lea.vmem [#allocation6], %s788_s6  ;;  %s674_s10 = scalar_lea.hbm %s1415_s3, %s812_s8 }
  0x24   : > { %399 = vmatpush.msra.mxu1 %v1142_v1  ;;  %v1159_v5 = vld [vmem:[%s1413_s1 + $0xe8] sm:$0xff]  ;;  %v298_v6 = vld [vmem:[%s1413_s1 + $0x60] sm:$0xff]  ;;  %v297_v8 = vld [vmem:[%s1413_s1 + $0x58] sm:$0xff]  ;;  %238 = vst.msk [vmem:[#allocation2] sm:$0xff] %vm237_vm0, %v1029_v0  ;;  %s675_s11 = sshll.u32 %s1355_s7, 4  ;;  %s677_s18 = sshll.u32 %s674_s10, 4  ;;  %s676_s11 = int_to_ptr.vmem [resolvable:$true] %s675_s11  ;;  %s678_s18 = int_to_ptr.hbm [resolvable:$true] %s677_s18 }
  0x25   : > { %335 = vmatpush.msra.mxu0 %v300_v2  ;;  %814 = vmatpush.msra.mxu3 %v300_v2  ;;  %v1168_v7 = vld [vmem:[%s1413_s1 + $0xe0] sm:$0xff]  ;;  %v1177_v9 = vld [vmem:[%s1413_s1 + $0xd8] sm:$0xff]  ;;  %v296_v10 = vld [vmem:[%s1413_s1 + $0x50] sm:$0xff]  ;;  %239 = vst.msk [vmem:[#allocation2 + $0x8] sm:$0xff] %vm237_vm0, %v1029_v0  ;;  %s663_s21 = scalar_lea.sflag [#allocation5], %s1126_s19  ;;  %s957_s23 = sshra.s32 %s678_s18, 4  ;;  %s958_s23 = int_to_ptr.hbm [resolvable:$true] %s957_s23 }
  0x26   : > { %400 = vmatpush.msra.mxu1 %v1150_v3  ;;  %v1186_v11 = vld [vmem:[%s1413_s1 + $0xd0] sm:$0xff]  ;;  %v295_v12 = vld [vmem:[%s1413_s1 + $0x48] sm:$0xff]  ;;  %v294_v14 = vld [vmem:[%s1413_s1 + $0x40] sm:$0xff]  ;;  %240 = vst.msk [vmem:[#allocation2 + $0x10] sm:$0xff] %vm237_vm0, %v1029_v0  ;;  %s959_s22 = scalar_lea.hbm %s958_s23, 128  ;;  %s963_s30 = scalar_lea.hbm %s1415_s3, 256 }
  0x27   : > { %336 = vmatpush.msra.mxu0 %v299_v4  ;;  %815 = vmatpush.msra.mxu3 %v299_v4  ;;  %v1195_v13 = vld [vmem:[%s1413_s1 + $0xc8] sm:$0xff]  ;;  %v1204_v15 = vld [vmem:[%s1413_s1 + $0xc0] sm:$0xff]  ;;  %v293_v16 = vld [vmem:[%s1413_s1 + $0x38] sm:$0xff]  ;;  %241 = vst.msk [vmem:[#allocation2 + $0x18] sm:$0xff] %vm237_vm0, %v1029_v0  ;;  %p960_p4 = scmp.ne.s32.totalorder %s958_s23, %s959_s22  ;;  %p964_p7 = scmp.lt.s32.totalorder %s958_s23, %s1415_s3 }
  0x28   : > { %401 = vmatpush.msra.mxu1 %v1159_v5  ;;  %v1213_v17 = vld [vmem:[%s1413_s1 + $0xb8] sm:$0xff]  ;;  %v292_v18 = vld [vmem:[%s1413_s1 + $0x30] sm:$0xff]  ;;  %v291_v20 = vld [vmem:[%s1413_s1 + $0x28] sm:$0xff]  ;;  %242 = vst.msk [vmem:[#allocation2 + $0x20] sm:$0xff] %vm237_vm0, %v1029_v0  ;;  %p965_p8 = scmp.lt.s32.totalorder %s963_s30, %s959_s22 }
  0x29   : > { %337 = vmatpush.msra.mxu0 %v298_v6  ;;  %816 = vmatpush.msra.mxu3 %v298_v6  ;;  %v308_v19 = vld [vmem:[%s1413_s1 + $0xb0] sm:$0xff]  ;;  %v307_v21 = vld [vmem:[%s1413_s1 + $0xa8] sm:$0xff]  ;;  %v290_v22 = vld [vmem:[%s1413_s1 + $0x20] sm:$0xff]  ;;  %243 = vst.msk [vmem:[#allocation2 + $0x28] sm:$0xff] %vm237_vm0, %v1029_v0  ;;  %p961_p5 = pnand %p960_p4, %p1103_p9 }
  0x2a   : > { %402 = vmatpush.msra.mxu1 %v1168_v7  ;;  %v306_v23 = vld [vmem:[%s1413_s1 + $0xa0] sm:$0xff]  ;;  %v289_v24 = vld [vmem:[%s1413_s1 + $0x18] sm:$0xff]  ;;  %v288_v26 = vld [vmem:[%s1413_s1 + $0x10] sm:$0xff]  ;;  %244 = vst.msk [vmem:[#allocation2 + $0x30] sm:$0xff] %vm237_vm0, %v1029_v0  ;;  %p966_p10 = por %p965_p8, %p964_p7 }
  0x2b   : > { %338 = vmatpush.msra.mxu0 %v297_v8  ;;  %817 = vmatpush.msra.mxu3 %v297_v8  ;;  %v305_v25 = vld [vmem:[%s1413_s1 + $0x98] sm:$0xff]  ;;  %v304_v27 = vld [vmem:[%s1413_s1 + $0x90] sm:$0xff]  ;;  %v287_v28 = vld [vmem:[%s1413_s1 + $0x8] sm:$0xff]  ;;  %245 = vst.msk [vmem:[#allocation2 + $0x38] sm:$0xff] %vm237_vm0, %v1029_v0  ;;  %p962_p6 = pneg %p961_p5 }
  0x2c   : > { %403 = vmatpush.msra.mxu1 %v1177_v9  ;;  %v303_v29 = vld [vmem:[%s1413_s1 + $0x88] sm:$0xff]  ;;  %v286_v30 = vld [vmem:[%s1413_s1] sm:$0xff]  ;;  %v276_v33 = vld [vmem:[%s1130_s29 + $0xb0] sm:$0xff]  ;;  %246 = vst.msk [vmem:[#allocation2 + $0x40] sm:$0xff] %vm237_vm0, %v1029_v0 }
  0x2d   : > { %339 = vmatpush.msra.mxu0 %v296_v10  ;;  %818 = vmatpush.msra.mxu3 %v296_v10  ;;  %v302_v31 = vld [vmem:[%s1413_s1 + $0x80] sm:$0xff]  ;;  %v255_v34 = vld [vmem:[%s1130_s29 + $0x8] sm:$0xff]  ;;  %v256_v35 = vld [vmem:[%s1130_s29 + $0x10] sm:$0xff]  ;;  %247 = vst.msk [vmem:[#allocation2 + $0x48] sm:$0xff] %vm237_vm0, %v1029_v0  ;;  %p967_p13 = pnand %p966_p10, %p962_p6 }
  0x2e   : > { %404 = vmatpush.msra.mxu1 %v1186_v11  ;;  %v254_v32 = vld [vmem:[%s1130_s29] sm:$0xff]  ;;  %v257_v37 = vld [vmem:[%s1130_s29 + $0x18] sm:$0xff]  ;;  %v280_v39 = vld [vmem:[%s1130_s29 + $0xd0] sm:$0xff]  ;;  %248 = vst.msk [vmem:[#allocation2 + $0x50] sm:$0xff] %vm237_vm0, %v1029_v0 }
  0x2f   : > { %340 = vmatpush.msra.mxu0 %v295_v12  ;;  %819 = vmatpush.msra.mxu3 %v295_v12  ;;  %v278_v36 = vld [vmem:[%s1130_s29 + $0xc0] sm:$0xff]  ;;  %v259_v40 = vld [vmem:[%s1130_s29 + $0x28] sm:$0xff]  ;;  %v260_v41 = vld [vmem:[%s1130_s29 + $0x30] sm:$0xff]  ;;  %249 = vst.msk [vmem:[#allocation2 + $0x58] sm:$0xff] %vm237_vm0, %v1029_v0 }
  0x30   : > { %405 = vmatpush.msra.mxu1 %v1195_v13  ;;  %v258_v38 = vld [vmem:[%s1130_s29 + $0x20] sm:$0xff]  ;;  %v261_v43 = vld [vmem:[%s1130_s29 + $0x38] sm:$0xff]  ;;  %v284_v45 = vld [vmem:[%s1130_s29 + $0xf0] sm:$0xff]  ;;  %250 = vst.msk [vmem:[#allocation2 + $0x60] sm:$0xff] %vm237_vm0, %v1029_v0 }
  0x31   : > { %341 = vmatpush.msra.mxu0 %v294_v14  ;;  %820 = vmatpush.msra.mxu3 %v294_v14  ;;  %v282_v42 = vld [vmem:[%s1130_s29 + $0xe0] sm:$0xff]  ;;  %v263_v46 = vld [vmem:[%s1130_s29 + $0x48] sm:$0xff]  ;;  %v264_v47 = vld [vmem:[%s1130_s29 + $0x50] sm:$0xff]  ;;  %251 = vst.msk [vmem:[#allocation2 + $0x68] sm:$0xff] %vm237_vm0, %v1029_v0 }
  0x32   : > { %406 = vmatpush.msra.mxu1 %v1204_v15  ;;  %v262_v44 = vld [vmem:[%s1130_s29 + $0x40] sm:$0xff]  ;;  %v265_v48 = vld [vmem:[%s1130_s29 + $0x58] sm:$0xff]  ;;  %v267_v51 = vld [vmem:[%s1130_s29 + $0x68] sm:$0xff]  ;;  %252 = vst.msk [vmem:[#allocation2 + $0x70] sm:$0xff] %vm237_vm0, %v1029_v0 }
  0x33   : > { %342 = vmatpush.msra.mxu0 %v293_v16  ;;  %821 = vmatpush.msra.mxu3 %v293_v16  ;;  %v277_v49 = vld [vmem:[%s1130_s29 + $0xb8] sm:$0xff]  ;;  %v266_v50 = vld [vmem:[%s1130_s29 + $0x60] sm:$0xff]  ;;  %v279_v52 = vld [vmem:[%s1130_s29 + $0xc8] sm:$0xff]  ;;  %253 = vst.msk [vmem:[#allocation2 + $0x78] sm:$0xff] %vm237_vm0, %v1029_v0 }
  0x34   : > { %407 = vmatpush.msra.mxu1 %v1213_v17  ;;  %v268_v53 = vld [vmem:[%s1130_s29 + $0x70] sm:$0xff]  ;;  %v269_v54 = vld [vmem:[%s1130_s29 + $0x78] sm:$0xff]  ;;  %v270_v56 = vld [vmem:[%s1130_s29 + $0x80] sm:$0xff] }
  0x35   : > { %343 = vmatpush.msra.mxu0 %v292_v18  ;;  %822 = vmatpush.msra.mxu3 %v292_v18  ;;  %v281_v55 = vld [vmem:[%s1130_s29 + $0xd8] sm:$0xff]  ;;  %v271_v57 = vld [vmem:[%s1130_s29 + $0x88] sm:$0xff]  ;;  %v272_v59 = vld [vmem:[%s1130_s29 + $0x90] sm:$0xff] }
  0x36   : > { %408 = vmatpush.msra.mxu1 %v308_v19  ;;  %v283_v58 = vld [vmem:[%s1130_s29 + $0xe8] sm:$0xff]  ;;  %v273_v60 = vld [vmem:[%s1130_s29 + $0x98] sm:$0xff]  ;;  %v274_v62 = vld [vmem:[%s1130_s29 + $0xa0] sm:$0xff] }
  0x37   : > { %344 = vmatpush.msra.mxu0 %v291_v20  ;;  %823 = vmatpush.msra.mxu3 %v291_v20  ;;  %v285_v61 = vld [vmem:[%s1130_s29 + $0xf8] sm:$0xff]  ;;  %v275_v63 = vld [vmem:[%s1130_s29 + $0xa8] sm:$0xff]  ;;  %v320_v16 = vld [vmem:[#allocation2 + $0x10] sm:$0xff] }
  0x38   : > { %409 = vmatpush.msra.mxu1 %v307_v21 }
  0x39   : > { %345 = vmatpush.msra.mxu0 %v290_v22  ;;  %824 = vmatpush.msra.mxu3 %v290_v22 }
  0x3a   : > { %410 = vmatpush.msra.mxu1 %v306_v23 }
  0x3b   : > { %346 = vmatpush.msra.mxu0 %v289_v24  ;;  %825 = vmatpush.msra.mxu3 %v289_v24 }
  0x3c   : > { %411 = vmatpush.msra.mxu1 %v305_v25 }
  0x3d   : > { %347 = vmatpush.msra.mxu0 %v288_v26  ;;  %826 = vmatpush.msra.mxu3 %v288_v26 }
  0x3e   : > { %412 = vmatpush.msra.mxu1 %v304_v27 }
  0x3f   : > { %348 = vmatpush.msra.mxu0 %v287_v28  ;;  %827 = vmatpush.msra.mxu3 %v287_v28 }
  0x40   : > { %413 = vmatpush.msra.mxu1 %v303_v29 }
  0x41   : > { %349 = vmatpush.msra.mxu0 %v286_v30  ;;  %828 = vmatpush.msra.mxu3 %v286_v30  ;;  %v322_v30 = vld [vmem:[#allocation2 + $0x20] sm:$0xff] }
  0x42   : > { %414 = vmatpush.msra.mxu1 %v302_v31  ;;  %350 = vmatmul.f32.vlgmr.msra.gmra.mxu0 %v254_v32 }
  0x43   : > { %383 = vmatmul.f32.vlgmr.msra.gmra.mxu3 %v276_v33  ;;  %415 = vmatmul.f32.vlgmr.msra.gmra.mxu1 %v255_v34 }
  0x44   : > { %829 = vmatpush.msrb.mxu3 %v1142_v1  ;;  %v516_v1 = vld [vmem:[%s1414_s2] sm:$0xff] }
  0x45   : > { %580 = vmatpush.msra.mxu2 %v516_v1 }
  0x46   : > { %830 = vmatpush.msrb.mxu3 %v1150_v3  ;;  %v318_v3 = vld [vmem:[#allocation2] sm:$0xff] }
  0x48   : > { %831 = vmatpush.msrb.mxu3 %v1159_v5 }
  0x4a   : > { %353 = vmatmul.f32.gmra.mxu0 %v256_v35  ;;  %832 = vmatpush.msrb.mxu3 %v1168_v7 }
  0x4b   : > { %386 = vmatmul.f32.gmra.mxu3 %v278_v36  ;;  %418 = vmatmul.f32.gmra.mxu1 %v257_v37  ;;  %v323_v37 = vld [vmem:[#allocation2 + $0x28] sm:$0xff] }
  0x4c   : > { %833 = vmatpush.msrb.mxu3 %v1177_v9  ;;  %v319_v9 = vld [vmem:[#allocation2 + $0x8] sm:$0xff] }
  0x4e   : > { %834 = vmatpush.msrb.mxu3 %v1186_v11 }
  0x50   : > { %835 = vmatpush.msrb.mxu3 %v1195_v13 }
  0x52   : > { %356 = vmatmul.f32.gmra.mxu0 %v258_v38  ;;  %836 = vmatpush.msrb.mxu3 %v1204_v15 }
  0x53   : > { %389 = vmatmul.f32.gmra.mxu3 %v280_v39  ;;  %421 = vmatmul.f32.gmra.mxu1 %v259_v40 }
  0x54   : > { %837 = vmatpush.msrb.mxu3 %v1213_v17 }
  0x56   : > { %838 = vmatpush.msrb.mxu3 %v308_v19 }
  0x58   : > { %839 = vmatpush.msrb.mxu3 %v307_v21 }
  0x5a   : > { %359 = vmatmul.f32.gmra.mxu0 %v260_v41  ;;  %840 = vmatpush.msrb.mxu3 %v306_v23  ;;  %v321_v23 = vld [vmem:[#allocation2 + $0x18] sm:$0xff] }
  0x5b   : > { %392 = vmatmul.f32.gmra.mxu3 %v282_v42  ;;  %424 = vmatmul.f32.gmra.mxu1 %v261_v43  ;;  %v329_v42 = vld [vmem:[#allocation2 + $0x58] sm:$0xff] }
  0x5c   : > { %841 = vmatpush.msrb.mxu3 %v305_v25 }
  0x5e   : > { %842 = vmatpush.msrb.mxu3 %v304_v27 }
  0x60   : > { %843 = vmatpush.msrb.mxu3 %v303_v29 }
  0x62   : > { %362 = vmatmul.f32.gmra.mxu0 %v262_v44  ;;  %844 = vmatpush.msrb.mxu3 %v302_v31 }
  0x63   : > { %395 = vmatmul.f32.gmra.mxu3 %v284_v45  ;;  %427 = vmatmul.f32.gmra.mxu1 %v263_v46  ;;  %v324_v46 = vld [vmem:[#allocation2 + $0x30] sm:$0xff] }
  0x64   : > { %845 = vmatpush.msra.mxu3 %v516_v1 }
  0x6a   : > { %365 = vmatmul.f32.gmra.mxu0 %v264_v47 }
  0x6b   : > { %430 = vmatmul.f32.gmra.mxu1 %v265_v48  ;;  %448 = vmatmul.f32.vlgmr.msrb.gmra.mxu3 %v277_v49 }
  0x72   : > { %368 = vmatmul.f32.gmra.mxu0 %v266_v50 }
  0x73   : > { %433 = vmatmul.f32.gmra.mxu1 %v267_v51  ;;  %451 = vmatmul.f32.gmra.mxu3 %v279_v52  ;;  %v330_v52 = vld [vmem:[#allocation2 + $0x60] sm:$0xff] }
  0x7a   : > { %371 = vmatmul.f32.gmra.mxu0 %v268_v53 }
  0x7b   : > { %436 = vmatmul.f32.gmra.mxu1 %v269_v54  ;;  %454 = vmatmul.f32.gmra.mxu3 %v281_v55 }
  0x82   : > { %374 = vmatmul.f32.gmra.mxu0 %v270_v56  ;;  %v325_v56 = vld [vmem:[#allocation2 + $0x38] sm:$0xff] }
  0x83   : > { %439 = vmatmul.f32.gmra.mxu1 %v271_v57  ;;  %457 = vmatmul.f32.gmra.mxu3 %v283_v58 }
  0x8a   : > { %377 = vmatmul.f32.gmra.mxu0 %v272_v59 }
  0x8b   : > { %442 = vmatmul.f32.gmra.mxu1 %v273_v60  ;;  %460 = vmatmul.f32.gmra.mxu3 %v285_v61 }
  0x92   : > { %380 = vmatmul.f32.gmra.mxu0 %v274_v62  ;;  %v331_v62 = vld [vmem:[#allocation2 + $0x68] sm:$0xff] }
  0x93   : > { %445 = vmatmul.f32.gmra.mxu1 %v275_v63 }
  0xbf   : > { %v351_v2 = vpop.f32.mrf.mxu0 }
  0xc0   : > { %v416_v4 = vpop.f32.mrf.mxu1 }
  0xc1   : > { %v417_v5 = vadd.f32 %v416_v4, %v351_v2  ;;  %v326_v2 = vld [vmem:[#allocation2 + $0x40] sm:$0xff] }
  0xc3   : > { %v464_v6 = vadd.f32 %v417_v5, %v318_v3 }
  0xc5   : > { %481 = vst.msk [vmem:[#allocation2] sm:$0xff] %vm237_vm0, %v464_v6 }
  0xc6   : > { %v384_v7 = vpop.f32.mrf.mxu3 }
  0xc7   : > { %v354_v8 = vpop.f32.mrf.mxu0 }
  0xc8   : > { %v419_v10 = vpop.f32.mrf.mxu1 }
  0xc9   : > { %v420_v11 = vadd.f32 %v419_v10, %v354_v8  ;;  %v332_v8 = vld [vmem:[#allocation2 + $0x70] sm:$0xff] }
  0xcb   : > { %v465_v12 = vadd.f32 %v420_v11, %v319_v9 }
  0xcc   : > { %v500_v13 = vld [vmem:[#allocation2] sm:$0xff] }
  0xcd   : > { %482 = vst.msk [vmem:[#allocation2 + $0x8] sm:$0xff] %vm237_vm0, %v465_v12  ;;  %789 = vmatmul.msk.f32.vlgmr.msra.gmra.mxu2 %vm237_vm0, %v500_v13  ;;  %v327_v12 = vld [vmem:[#allocation2 + $0x48] sm:$0xff] }
  0xce   : > { %v387_v14 = vpop.f32.mrf.mxu3 }
  0xcf   : > { %v357_v15 = vpop.f32.mrf.mxu0 }
  0xd0   : > { %v422_v17 = vpop.f32.mrf.mxu1 }
  0xd1   : > { %v423_v18 = vadd.f32 %v422_v17, %v357_v15 }
  0xd3   : > { %v466_v19 = vadd.f32 %v423_v18, %v320_v16  ;;  %v333_v18 = vld [vmem:[#allocation2 + $0x78] sm:$0xff] }
  0xd4   : > { %v501_v20 = vld [vmem:[#allocation2 + $0x8] sm:$0xff] }
  0xd5   : > { %483 = vst.msk [vmem:[#allocation2 + $0x10] sm:$0xff] %vm237_vm0, %v466_v19  ;;  %790 = vmatmul.msk.f32.gmra.mxu2 %vm237_vm0, %v501_v20 }
  0xd6   : > { %v390_v21 = vpop.f32.mrf.mxu3 }
  0xd7   : > { %v360_v22 = vpop.f32.mrf.mxu0 }
  0xd8   : > { %v425_v24 = vpop.f32.mrf.mxu1 }
  0xd9   : > { %v426_v25 = vadd.f32 %v425_v24, %v360_v22  ;;  %v328_v22 = vld [vmem:[#allocation2 + $0x50] sm:$0xff] }
  0xdb   : > { %v467_v26 = vadd.f32 %v426_v25, %v321_v23 }
  0xdc   : > { %v502_v27 = vld [vmem:[#allocation2 + $0x10] sm:$0xff] }
  0xdd   : > { %484 = vst.msk [vmem:[#allocation2 + $0x18] sm:$0xff] %vm237_vm0, %v467_v26  ;;  %791 = vmatmul.msk.f32.gmra.mxu2 %vm237_vm0, %v502_v27 }
  0xde   : > { %v393_v28 = vpop.f32.mrf.mxu3 }
  0xdf   : > { %v363_v29 = vpop.f32.mrf.mxu0 }
  0xe0   : > { %v428_v31 = vpop.f32.mrf.mxu1 }
  0xe1   : > { %v429_v32 = vadd.f32 %v428_v31, %v363_v29 }
  0xe3   : > { %v468_v33 = vadd.f32 %v429_v32, %v322_v30 }
  0xe4   : > { %v503_v34 = vld [vmem:[#allocation2 + $0x18] sm:$0xff] }
  0xe5   : > { %485 = vst.msk [vmem:[#allocation2 + $0x20] sm:$0xff] %vm237_vm0, %v468_v33  ;;  %792 = vmatmul.msk.f32.gmra.mxu2 %vm237_vm0, %v503_v34 }
  0xe6   : > { %v1328_v35 = vpop.f32.mrf.mxu3 }
  0xe7   : > { %v366_v36 = vpop.f32.mrf.mxu0 }
  0xe8   : > { %v431_v38 = vpop.f32.mrf.mxu1 }
  0xe9   : > { %v432_v39 = vadd.f32 %v431_v38, %v366_v36 }
  0xeb   : > { %v469_v40 = vadd.f32 %v432_v39, %v323_v37 }
  0xec   : > { %v504_v41 = vld [vmem:[#allocation2 + $0x20] sm:$0xff] }
  0xed   : > { %486 = vst.msk [vmem:[#allocation2 + $0x28] sm:$0xff] %vm237_vm0, %v469_v40  ;;  %793 = vmatmul.msk.f32.gmra.mxu2 %vm237_vm0, %v504_v41 }
  0xee   : > { %v449_v43 = vpop.f32.mrf.mxu3 }
  0xef   : > { %v450_v44 = vadd.f32 %v449_v43, %v384_v7  ;;  %v369_v45 = vpop.f32.mrf.mxu0 }
  0xf0   : > { %v434_v47 = vpop.f32.mrf.mxu1 }
  0xf1   : > { %v475_v48 = vadd.f32 %v450_v44, %v329_v42  ;;  %v435_v49 = vadd.f32 %v434_v47, %v369_v45 }
  0xf3   : > { %492 = vst.msk [vmem:[#allocation2 + $0x58] sm:$0xff] %vm237_vm0, %v475_v48  ;;  %v470_v50 = vadd.f32 %v435_v49, %v324_v46 }
  0xf4   : > { %v505_v51 = vld [vmem:[#allocation2 + $0x28] sm:$0xff] }
  0xf5   : > { %487 = vst.msk [vmem:[#allocation2 + $0x30] sm:$0xff] %vm237_vm0, %v470_v50  ;;  %794 = vmatmul.msk.f32.gmra.mxu2 %vm237_vm0, %v505_v51 }
  0xf6   : > { %v452_v53 = vpop.f32.mrf.mxu3 }
  0xf7   : > { %v453_v54 = vadd.f32 %v452_v53, %v387_v14  ;;  %v372_v55 = vpop.f32.mrf.mxu0 }
  0xf8   : > { %v437_v57 = vpop.f32.mrf.mxu1 }
  0xf9   : > { %v476_v58 = vadd.f32 %v453_v54, %v330_v52  ;;  %v438_v59 = vadd.f32 %v437_v57, %v372_v55 }
  0xfa   : > { %v511_v30 = vld [vmem:[#allocation2 + $0x58] sm:$0xff] }
  0xfb   : > { %493 = vst.msk [vmem:[#allocation2 + $0x60] sm:$0xff] %vm237_vm0, %v476_v58  ;;  %v471_v60 = vadd.f32 %v438_v59, %v325_v56 }
  0xfc   : > { %v506_v61 = vld [vmem:[#allocation2 + $0x30] sm:$0xff] }
  0xfd   : > { %488 = vst.msk [vmem:[#allocation2 + $0x38] sm:$0xff] %vm237_vm0, %v471_v60  ;;  %795 = vmatmul.msk.f32.gmra.mxu2 %vm237_vm0, %v506_v61 }
  0xfe   : > { %v455_v63 = vpop.f32.mrf.mxu3 }
  0xff   : > { %v456_v0 = vadd.f32 %v455_v63, %v390_v21  ;;  %v375_v1 = vpop.f32.mrf.mxu0 }
 0x100   : > { %v440_v3 = vpop.f32.mrf.mxu1 }
 0x101   : > { %v477_v4 = vadd.f32 %v456_v0, %v331_v62  ;;  %v441_v5 = vadd.f32 %v440_v3, %v375_v1 }
 0x102   : > { %v512_v31 = vld [vmem:[#allocation2 + $0x60] sm:$0xff] }
 0x103   : > { %494 = vst.msk [vmem:[#allocation2 + $0x68] sm:$0xff] %vm237_vm0, %v477_v4  ;;  %v472_v6 = vadd.f32 %v441_v5, %v326_v2 }
 0x104   : > { %v507_v7 = vld [vmem:[#allocation2 + $0x38] sm:$0xff] }
 0x105   : > { %489 = vst.msk [vmem:[#allocation2 + $0x40] sm:$0xff] %vm237_vm0, %v472_v6  ;;  %796 = vmatmul.msk.f32.gmra.mxu2 %vm237_vm0, %v507_v7 }
 0x106   : > { %v458_v9 = vpop.f32.mrf.mxu3 }
 0x107   : > { %v459_v10 = vadd.f32 %v458_v9, %v393_v28  ;;  %v378_v11 = vpop.f32.mrf.mxu0 }
 0x108   : > { %v443_v13 = vpop.f32.mrf.mxu1 }
 0x109   : > { %v478_v14 = vadd.f32 %v459_v10, %v332_v8  ;;  %v444_v15 = vadd.f32 %v443_v13, %v378_v11 }
 0x10a   : > { %v513_v32 = vld [vmem:[#allocation2 + $0x68] sm:$0xff] }
 0x10b   : > { %495 = vst.msk [vmem:[#allocation2 + $0x70] sm:$0xff] %vm237_vm0, %v478_v14  ;;  %v473_v16 = vadd.f32 %v444_v15, %v327_v12 }
 0x10c   : > { %v508_v17 = vld [vmem:[#allocation2 + $0x40] sm:$0xff] }
 0x10d   : > { %490 = vst.msk [vmem:[#allocation2 + $0x48] sm:$0xff] %vm237_vm0, %v473_v16  ;;  %797 = vmatmul.msk.f32.gmra.mxu2 %vm237_vm0, %v508_v17 }
 0x10e   : > { %v461_v19 = vpop.f32.mrf.mxu3 }
 0x10f   : > { %v462_v20 = vadd.f32 %v461_v19, %v1328_v35  ;;  %v381_v21 = vpop.f32.mrf.mxu0 }
 0x110   : > { %v446_v23 = vpop.f32.mrf.mxu1 }
 0x111   : > { %v479_v24 = vadd.f32 %v462_v20, %v333_v18  ;;  %v447_v25 = vadd.f32 %v446_v23, %v381_v21 }
 0x112   : > { %v514_v33 = vld [vmem:[#allocation2 + $0x70] sm:$0xff] }
 0x113   : > { %496 = vst.msk [vmem:[#allocation2 + $0x78] sm:$0xff] %vm237_vm0, %v479_v24  ;;  %v474_v26 = vadd.f32 %v447_v25, %v328_v22 }
 0x114   : > { %v509_v27 = vld [vmem:[#allocation2 + $0x48] sm:$0xff] }
 0x115   : > { %491 = vst.msk [vmem:[#allocation2 + $0x50] sm:$0xff] %vm237_vm0, %v474_v26  ;;  %798 = vmatmul.msk.f32.gmra.mxu2 %vm237_vm0, %v509_v27 }
 0x11a   : > { %v515_v28 = vld [vmem:[#allocation2 + $0x78] sm:$0xff] }
 0x11b   : > { %804 = vmatmul.msk.f32.vlgmr.msra.gmra.mxu3 %vm237_vm0, %v515_v28 }
 0x11c   : > { %v510_v29 = vld [vmem:[#allocation2 + $0x50] sm:$0xff] }
 0x11d   : > { %799 = vmatmul.msk.f32.gmra.mxu2 %vm237_vm0, %v510_v29 }
 0x125   : > { %800 = vmatmul.msk.f32.gmra.mxu2 %vm237_vm0, %v511_v30 }
 0x12d   : > { %801 = vmatmul.msk.f32.gmra.mxu2 %vm237_vm0, %v512_v31 }
 0x135   : > { %802 = vmatmul.msk.f32.gmra.mxu2 %vm237_vm0, %v513_v32 }
 0x13d   : > { %803 = vmatmul.msk.f32.gmra.mxu2 %vm237_vm0, %v514_v33 }
 0x150   : > { %v582_v34 = vpop.f32.mrf.mxu2 }
 0x151   : > { %v630_v35 = vmax.f32 %v582_v34, 0.0 }
 0x153   : > { %646 = vst [vmem:[%s1355_s7] sm:$0xff] %v630_v35 }
 0x158   : > { %v585_v36 = vpop.f32.mrf.mxu2 }
 0x159   : > { %v631_v37 = vmax.f32 %v585_v36, 0.0 }
 0x15b   : > { %647 = vst [vmem:[%s1355_s7 + $0x8] sm:$0xff] %v631_v37 }
 0x160   : > { %v588_v38 = vpop.f32.mrf.mxu2 }
 0x161   : > { %v632_v39 = vmax.f32 %v588_v38, 0.0 }
 0x163   : > { %648 = vst [vmem:[%s1355_s7 + $0x10] sm:$0xff] %v632_v39 }
 0x168   : > { %v591_v40 = vpop.f32.mrf.mxu2 }
 0x169   : > { %v633_v41 = vmax.f32 %v591_v40, 0.0 }
 0x16b   : > { %649 = vst [vmem:[%s1355_s7 + $0x18] sm:$0xff] %v633_v41 }
 0x170   : > { %v594_v42 = vpop.f32.mrf.mxu2 }
 0x171   : > { %v634_v43 = vmax.f32 %v594_v42, 0.0 }
 0x173   : > { %650 = vst [vmem:[%s1355_s7 + $0x20] sm:$0xff] %v634_v43 }
 0x178   : > { %v597_v44 = vpop.f32.mrf.mxu2 }
 0x179   : > { %v635_v45 = vmax.f32 %v597_v44, 0.0 }
 0x17b   : > { %651 = vst [vmem:[%s1355_s7 + $0x28] sm:$0xff] %v635_v45 }
 0x180   : > { %v600_v46 = vpop.f32.mrf.mxu2 }
 0x181   : > { %v636_v47 = vmax.f32 %v600_v46, 0.0 }
 0x183   : > { %652 = vst [vmem:[%s1355_s7 + $0x30] sm:$0xff] %v636_v47 }
 0x188   : > { %v603_v48 = vpop.f32.mrf.mxu2 }
 0x189   : > { %v637_v49 = vmax.f32 %v603_v48, 0.0 }
 0x18b   : > { %653 = vst [vmem:[%s1355_s7 + $0x38] sm:$0xff] %v637_v49 }
 0x190   : > { %v606_v50 = vpop.f32.mrf.mxu2 }
 0x191   : > { %v638_v51 = vmax.f32 %v606_v50, 0.0 }
 0x193   : > { %654 = vst [vmem:[%s1355_s7 + $0x40] sm:$0xff] %v638_v51 }
 0x198   : > { %v609_v52 = vpop.f32.mrf.mxu2 }
 0x199   : > { %v639_v53 = vmax.f32 %v609_v52, 0.0 }
 0x19b   : > { %655 = vst [vmem:[%s1355_s7 + $0x48] sm:$0xff] %v639_v53 }
 0x19e   : > { %v627_v54 = vpop.f32.mrf.mxu3 }
 0x19f   : > { %v645_v55 = vmax.f32 %v627_v54, 0.0 }
 0x1a0   : > { %v612_v56 = vpop.f32.mrf.mxu2 }
 0x1a1   : > { %661 = vst [vmem:[%s1355_s7 + $0x78] sm:$0xff] %v645_v55  ;;  %v640_v57 = vmax.f32 %v612_v56, 0.0 }
 0x1a3   : > { %656 = vst [vmem:[%s1355_s7 + $0x50] sm:$0xff] %v640_v57 }
 0x1a8   : > { %v615_v58 = vpop.f32.mrf.mxu2 }
 0x1a9   : > { %v641_v59 = vmax.f32 %v615_v58, 0.0 }
 0x1ab   : > { %657 = vst [vmem:[%s1355_s7 + $0x58] sm:$0xff] %v641_v59 }
 0x1b0   : > { %v618_v60 = vpop.f32.mrf.mxu2 }
 0x1b1   : > { %v642_v61 = vmax.f32 %v618_v60, 0.0 }
 0x1b3   : > { %658 = vst [vmem:[%s1355_s7 + $0x60] sm:$0xff] %v642_v61 }
 0x1b8   : > { %v621_v62 = vpop.f32.mrf.mxu2 }
 0x1b9   : > { %v643_v63 = vmax.f32 %v621_v62, 0.0 }
 0x1bb   : > { %659 = vst [vmem:[%s1355_s7 + $0x68] sm:$0xff] %v643_v63 }
 0x1c0   : > { %v624_v0 = vpop.f32.mrf.mxu2 }
 0x1c1   : > { %v644_v1 = vmax.f32 %v624_v0, 0.0 }
 0x1c3   : > { %660 = vst [vmem:[%s1355_s7 + $0x70] sm:$0xff] %v644_v1 }
 0x1c4   : > { %970 = shalt.err (!%p967_p13)
}
 0x1c5   : > { %s1030_s19 = smov 128   ;;  %s1031_s5 = smov 8  }
 0x1c6   : > { %848 = dma.vmem_to_hbm [thread:$0]  (%p1103_p9), %s676_s11, 2048, %s678_s18, %s663_s21, %s1030_s19, %s1030_s19, %s1031_s5  }
 0x1c7 PF: > { %s692_s6 = sand.u32 1, %s1005_s12   ;;  %p855_p0 = pnand %p781_p12, %p1110_p11 }
 0x1c8   : > { %s693_s7 = scalar_lea.sflag [#allocation5], %s692_s6 }
 0x1c9   : > { %p856_p1 = pneg %p855_p0 }
 0x1cb   : > { %1000 = dma.done.wait (%p856_p1), %s693_s7, 2048  }
 0x1cc   : > { %1002 = vsyncadd (%p856_p1), %s693_s7, 4294965248  ;;  %s19_s17 = sadd.s32 1, %s1025_s17   ;;  %s1420_s12 = smov %s1009_s13 }
 0x1cd   : > { %p16_p2 = scmp.ge.s32.totalorder %s19_s17, 4   ;;  %s1421_s13 = smov %s1013_s14 }
 0x1ce   : > { %s1422_s14 = smov %s1108_s26  ;;  %s1423_s15 = smov %s1021_s16 }
 0x1cf   : > { %s1424_s16 = smov %s1426_s20  ;;  %18 = sbr.rel (!%p16_p2) target bundleno = 6 (0x6), region = 88 }
 0x1d4   :  { %699 = vsyncpa [#allocation4], 1 }
 0x1d5   :  { %701 = vsyncpa [#allocation4 + $0x1], 1 }
 0x1d6   :  { %702 = vsyncpa [#allocation5], 1 }
 0x1d7   :  { %704 = vsyncpa [#allocation5 + $0x1], 1 }

</bundles_post_ra>
